<compile_context>
chip_gen: v7x
topology: tpu7x:2x2x1
jax: 0.10.0
libtpu: 0.0.40
codegen_flags: <defaults>
</compile_context>

<pallas_src>
import jax
import jax.numpy as jnp
from jax.experimental import pallas as pl
from jax.experimental.pallas import tpu as pltpu

BN_EPS = 1e-5


def _stats_kernel(x_ref, w_ref, sum_ref, sumsq_ref):
    # x_ref:   (1, C_in, TL)   input tile (native NCL layout, L on lanes)
    # w_ref:   (C_out, C_in)   1x1-conv weight
    # sum_ref, sumsq_ref: (C_out, 1) fp32 accumulators, resident across the grid.
    @pl.when(jnp.logical_and(pl.program_id(0) == 0, pl.program_id(1) == 0))
    def _():
        sum_ref[...] = jnp.zeros_like(sum_ref)
        sumsq_ref[...] = jnp.zeros_like(sumsq_ref)

    # 1x1 conv == matmul; fp32 accumulation on the MXU, no operand pre-cast.
    y = jnp.dot(w_ref[...], x_ref[0], preferred_element_type=jnp.float32)  # (C_out, TL)
    sum_ref[...] += jnp.sum(y, axis=1, keepdims=True)
    sumsq_ref[...] += jnp.sum(y * y, axis=1, keepdims=True)


def _apply_kernel(x_ref, w_ref, p_ref, o_ref):
    # p_ref: (C_out, 2) fp32 -- column 0 = scale, column 1 = shift.
    # o_ref: (1, C_out, TL) -- lane-dense along L.
    y = jnp.dot(w_ref[...], x_ref[0], preferred_element_type=jnp.float32)  # (C_out, TL)
    p = p_ref[...]
    scale = p[:, 0:1]
    shift = p[:, 1:2]
    o_ref[0] = jnp.maximum(y * scale + shift, 0.0).astype(o_ref.dtype)


def _choose_l_tile(L, max_lanes=1024):
    """Largest multiple of 128 (<= max_lanes) dividing L; else one full-L tile."""
    if L % 128 == 0:
        t = min(max_lanes, L)
        t -= t % 128
        while L % t:
            t -= 128
        return t
    return L  # small / irregular L: single full-length tile (valid full-dim block)


def _compiler_params(semantics, c_in, c_out, tl, itemsize):
    tile_bytes = (c_in + c_out) * tl * itemsize          # one x tile + one out tile
    const_bytes = (c_out * c_in + 4 * c_out) * 4          # weights + params/stats
    vmem = 4 * tile_bytes + 2 * const_bytes + (2 << 20)   # double-buffering + headroom
    vmem = int(min(max(vmem, 4 << 20), 64 << 20))         # stay within v7x VMEM
    return pltpu.CompilerParams(dimension_semantics=semantics,
                                vmem_limit_bytes=vmem)


def mlp_forward(x_ncl, conv_w, conv_b, bn_gamma, bn_beta, *, max_l_tile=1024):
    """F.relu(BatchNorm1d(Conv1d(k=1)(x))) with train-mode batch statistics.

    x_ncl: (B, C_in, L), conv_w: (C_out, C_in, 1). Returns (B, C_out, L).
    conv_b is accepted for API parity but is mathematically cancelled by
    train-mode BatchNorm, so it is not used inside the kernels.
    """
    del conv_b  # cancelled exactly by the mean subtraction in train-mode BN
    B, C_in, L = x_ncl.shape
    C_out = conv_w.shape[0]

    TL = _choose_l_tile(L, max_l_tile)
    grid = (B, L // TL)
    itemsize = jnp.dtype(x_ncl.dtype).itemsize

    w = conv_w.reshape(C_out, C_in)

    x_spec = pl.BlockSpec((1, C_in, TL), lambda b, l: (b, 0, l))
    w_spec = pl.BlockSpec((C_out, C_in), lambda b, l: (0, 0))

    # ---- Sweep 1: per-channel sum / sum-of-squares of y = W @ x over batch*length.
    sums, sumsqs = pl.pallas_call(
        _stats_kernel,
        out_shape=(jax.ShapeDtypeStruct((C_out, 1), jnp.float32),
                   jax.ShapeDtypeStruct((C_out, 1), jnp.float32)),
        grid=grid,
        in_specs=[x_spec, w_spec],
        out_specs=(pl.BlockSpec((C_out, 1), lambda b, l: (0, 0)),
                   pl.BlockSpec((C_out, 1), lambda b, l: (0, 0))),
        compiler_params=_compiler_params(("arbitrary", "arbitrary"),
                                         C_in, C_out, TL, itemsize),
    )(x_ncl, w)

    # Tiny (C_out,)-sized math stays in plain JAX; fp32 throughout.
    count = float(B * L)
    mean = sums[:, 0] / count
    var = jnp.maximum(sumsqs[:, 0] / count - mean * mean, 0.0)
    scale = bn_gamma.astype(jnp.float32) * jax.lax.rsqrt(var + BN_EPS)
    shift = bn_beta.astype(jnp.float32) - mean * scale
    params = jnp.stack([scale, shift], axis=1)  # (C_out, 2) fp32

    # ---- Sweep 2: recompute y per tile, apply fused scale/shift + ReLU.
    out = pl.pallas_call(
        _apply_kernel,
        out_shape=jax.ShapeDtypeStruct((B, C_out, L), x_ncl.dtype),
        grid=grid,
        in_specs=[x_spec,
                  w_spec,
                  pl.BlockSpec((C_out, 2), lambda b, l: (0, 0))],
        out_specs=pl.BlockSpec((1, C_out, TL), lambda b, l: (b, 0, l)),
        compiler_params=_compiler_params(("parallel", "parallel"),
                                         C_in, C_out, TL, itemsize),
    )(x_ncl, w, params)
    return out


def reference_forward(x_ncl, conv_w, conv_b, bn_gamma, bn_beta):
    """Pure-JAX reference of F.relu(bn(conv(x))) with train-mode BN (bias kept)."""
    C_out, C_in, _ = conv_w.shape
    w = conv_w.reshape(C_out, C_in)
    y = jnp.einsum("bil,oi->bol", x_ncl, w) + conv_b[None, :, None]
    mean = jnp.mean(y, axis=(0, 2), keepdims=True)
    var = jnp.mean((y - mean) ** 2, axis=(0, 2), keepdims=True)
    y_hat = (y - mean) / jnp.sqrt(var + BN_EPS)
    out = y_hat * bn_gamma[None, :, None] + bn_beta[None, :, None]
    return jnp.maximum(out, 0.0)


if __name__ == "__main__":
    key = jax.random.PRNGKey(0)
    B, C_in, C_out, L = 2, 4, 32, 16

    k_x, k_w, k_b = jax.random.split(key, 3)
    x = jax.random.normal(k_x, (B, C_in, L), dtype=jnp.float32)

    # Deterministic parameter init (Conv1d weight: (C_out, C_in, 1)).
    bound = 1.0 / jnp.sqrt(C_in)
    conv_w = jax.random.uniform(k_w, (C_out, C_in, 1), jnp.float32, -bound, bound)
    conv_b = jax.random.uniform(k_b, (C_out,), jnp.float32, -bound, bound)
    bn_gamma = jnp.ones((C_out,), jnp.float32)   # PyTorch BN default init
    bn_beta = jnp.zeros((C_out,), jnp.float32)

    out = mlp_forward(x, conv_w, conv_b, bn_gamma, bn_beta)
    out = jax.block_until_ready(out)

    ref = reference_forward(x, conv_w, conv_b, bn_gamma, bn_beta)
    assert out.shape == (B, C_out, L)
    assert jnp.allclose(out, ref, atol=1e-5, rtol=1e-5), "mismatch vs reference"
    print("KERNEL_OK")
</pallas_src>

<mosaic_0001>
module attributes {stable_mosaic.version = 11 : i64} {
  func.func @_stats_kernel(%arg0: i32, %arg1: i32, %arg2: memref<1x4x16xf32, #tpu.memory_space<vmem>>, %arg3: memref<32x4xf32, #tpu.memory_space<vmem>>, %arg4: memref<32x1xf32, #tpu.memory_space<vmem>>, %arg5: memref<32x1xf32, #tpu.memory_space<vmem>>) attributes {dimension_semantics = [#tpu.dimension_semantics<arbitrary>, #tpu.dimension_semantics<arbitrary>], iteration_bounds = array<i64: 2, 1>, scalar_prefetch = 0 : i64, scratch_operands = 0 : i64, tpu.core_type = #tpu.core_type<tc>, window_params = [{transform_indices = @transform_0, window_bounds = array<i64: 1, 4, 16>}, {pipeline_mode = #tpu.pipeline_mode<synchronous>, transform_indices = @transform_1, window_bounds = array<i64: 32, 4>}, {pipeline_mode = #tpu.pipeline_mode<synchronous>, transform_indices = @transform_2, window_bounds = array<i64: 32, 1>}, {pipeline_mode = #tpu.pipeline_mode<synchronous>, transform_indices = @transform_3, window_bounds = array<i64: 32, 1>}]} {
    %c0_i32 = arith.constant 0 : i32
    %0 = arith.cmpi eq, %arg0, %c0_i32 : i32
    %c0_i32_0 = arith.constant 0 : i32
    %1 = arith.cmpi eq, %arg1, %c0_i32_0 : i32
    %2 = arith.andi %0, %1 : i1
    %3 = arith.extui %2 : i1 to i32
    %c0_i32_1 = arith.constant 0 : i32
    %4 = arith.cmpi ne, %3, %c0_i32_1 : i32
    scf.if %4 {
      %cst_16 = arith.constant 0.000000e+00 : f32
      %20 = vector.broadcast %cst_16 : f32 to vector<32x1xf32>
      %c0_17 = arith.constant 0 : index
      %c0_18 = arith.constant 0 : index
      %21 = vector.load %arg4[%c0_17, %c0_18] : memref<32x1xf32, #tpu.memory_space<vmem>>, vector<32x1xf32>
      tpu.vector_store %arg4[%c0_17, %c0_18], %20 {strides = array<i32>} : memref<32x1xf32, #tpu.memory_space<vmem>>, vector<32x1xf32>,
      %cst_19 = arith.constant 0.000000e+00 : f32
      %22 = vector.broadcast %cst_19 : f32 to vector<32x1xf32>
      %c0_20 = arith.constant 0 : index
      %c0_21 = arith.constant 0 : index
      %23 = vector.load %arg5[%c0_20, %c0_21] : memref<32x1xf32, #tpu.memory_space<vmem>>, vector<32x1xf32>
      tpu.vector_store %arg5[%c0_20, %c0_21], %22 {strides = array<i32>} : memref<32x1xf32, #tpu.memory_space<vmem>>, vector<32x1xf32>,
    } else {
    }
    %c0 = arith.constant 0 : index
    %c0_2 = arith.constant 0 : index
    %5 = vector.load %arg3[%c0, %c0_2] : memref<32x4xf32, #tpu.memory_space<vmem>>, vector<32x4xf32>
    %c0_3 = arith.constant 0 : index
    %c0_4 = arith.constant 0 : index
    %c0_5 = arith.constant 0 : index
    %6 = vector.load %arg2[%c0_3, %c0_4, %c0_5] : memref<1x4x16xf32, #tpu.memory_space<vmem>>, vector<1x4x16xf32>
    %7 = vector.shape_cast %6 : vector<1x4x16xf32> to vector<4x16xf32>
    %cst = arith.constant dense<0.000000e+00> : vector<32x16xf32>
    %8 = tpu.matmul %5, %7, %cst {dimension_numbers = #tpu.dot_dimension_numbers<[1], [0], [0], [1], [0, 0, 1, 1], [], []>} : vector<32x4xf32>, vector<4x16xf32>, vector<32x16xf32> -> vector<32x16xf32>
    %c0_6 = arith.constant 0 : index
    %c0_7 = arith.constant 0 : index
    %9 = vector.load %arg4[%c0_6, %c0_7] : memref<32x1xf32, #tpu.memory_space<vmem>>, vector<32x1xf32>
    %cst_8 = arith.constant dense<0.000000e+00> : vector<32xf32>
    %10 = vector.multi_reduction <add>, %8, %cst_8 [1] : vector<32x16xf32> to vector<32xf32>
    %11 = vector.shape_cast %10 : vector<32xf32> to vector<32x1xf32>
    %12 = arith.addf %9, %11 : vector<32x1xf32>
    %c0_9 = arith.constant 0 : index
    %c0_10 = arith.constant 0 : index
    %13 = vector.load %arg4[%c0_9, %c0_10] : memref<32x1xf32, #tpu.memory_space<vmem>>, vector<32x1xf32>
    tpu.vector_store %arg4[%c0_9, %c0_10], %12 {strides = array<i32>} : memref<32x1xf32, #tpu.memory_space<vmem>>, vector<32x1xf32>,
    %c0_11 = arith.constant 0 : index
    %c0_12 = arith.constant 0 : index
    %14 = vector.load %arg5[%c0_11, %c0_12] : memref<32x1xf32, #tpu.memory_space<vmem>>, vector<32x1xf32>
    %15 = arith.mulf %8, %8 : vector<32x16xf32>
    %cst_13 = arith.constant dense<0.000000e+00> : vector<32xf32>
    %16 = vector.multi_reduction <add>, %15, %cst_13 [1] : vector<32x16xf32> to vector<32xf32>
    %17 = vector.shape_cast %16 : vector<32xf32> to vector<32x1xf32>
    %18 = arith.addf %14, %17 : vector<32x1xf32>
    %c0_14 = arith.constant 0 : index
    %c0_15 = arith.constant 0 : index
    %19 = vector.load %arg5[%c0_14, %c0_15] : memref<32x1xf32, #tpu.memory_space<vmem>>, vector<32x1xf32>
    tpu.vector_store %arg5[%c0_14, %c0_15], %18 {strides = array<i32>} : memref<32x1xf32, #tpu.memory_space<vmem>>, vector<32x1xf32>,
    return
  }
  func.func @transform_0(%arg0: i32, %arg1: i32) -> (i32, i32, i32) {
    %c0_i32 = arith.constant 0 : i32
    %c0_i32_0 = arith.constant 0 : i32
    return %arg0, %c0_i32, %arg1 : i32, i32, i32
  }
  func.func @transform_1(%arg0: i32, %arg1: i32) -> (i32, i32) {
    %c0_i32 = arith.constant 0 : i32
    %c0_i32_0 = arith.constant 0 : i32
    %c0_i32_1 = arith.constant 0 : i32
    return %c0_i32, %c0_i32_0 : i32, i32
  }
  func.func @transform_2(%arg0: i32, %arg1: i32) -> (i32, i32) {
    %c0_i32 = arith.constant 0 : i32
    %c0_i32_0 = arith.constant 0 : i32
    %c0_i32_1 = arith.constant 0 : i32
    return %c0_i32, %c0_i32_0 : i32, i32
  }
  func.func @transform_3(%arg0: i32, %arg1: i32) -> (i32, i32) {
    %c0_i32 = arith.constant 0 : i32
    %c0_i32_0 = arith.constant 0 : i32
    %c0_i32_1 = arith.constant 0 : i32
    return %c0_i32, %c0_i32_0 : i32, i32
  }
}

</mosaic_0001>

<bundles_post_ra>
// kernel: tpu_custom_call.1
= control target key start
LH: loop header
LB: loop body
LE: loop exit
PB: predicated region body
PF: predicated region fallthrough
CT: control target
= control target key end

     0   :  { %s494_s12 = smov 0   ;;  %s496_s13 = smov 0   ;;  %s624_s0 = inlined_call_operand.vmem [shape: f32[2,4,16], index: 0, kind: input, shape index: {}]   ;;  %s625_s1 = inlined_call_operand.vmem [shape: f32[32,4], index: 1, kind: input, shape index: {}]   ;;  %s626_s2 = inlined_call_operand.vmem [shape: f32[32,1], index: 2, kind: output, shape index: {0}]   ;;  %s627_s3 = inlined_call_operand.vmem [shape: f32[32,1], index: 3, kind: output, shape index: {1}]  }
   0x1   :  { %s498_s14 = smov 0  }
   0x2 LB: > { %s26_s15 = sadd.s32 1, %s467_s13  ;;  %p398_p0 = scmp.ge.s32.totalorder %s471_s14, 1  ;;  %s471_s14 = sphi %s498_s14, %s14_s14   ;;  %s467_s13 = sphi %s496_s13, %s629_s13   ;;  %s463_s12 = sphi %s494_s12, %s628_s12  }
   0x3   : > { %p28_p1 = scmp.ge.s32.totalorder %s26_s15, 2  ;;  %p146_p2 = scmp.lt.s32.totalorder %s471_s14, 3 }
   0x5   : > { %s631_s15 = smov (%p28_p1, %s26_s15), 0  ;;  %p147_p3 = pnand %p398_p0, %p146_p2 }
   0x6   : > { %p167_p4 = scmp.lt.s32.totalorder (!%p147_p3), %s463_s12, 1  ;;  %p174_p5 = scmp.eq.s32.totalorder (!%p147_p3), %s463_s12, 0 }
   0x7   : > { %150 = sbr.rel (%p147_p3) target bundleno = 395 (0x18b), region = 28 }
   0xe   : > { %s633_s12 = smov (!%p167_p4, %s463_s12), 1  ;;  %179 = sbr.rel (!%p174_p5) target bundleno = 21 (0x15), region = 32 }
   0xf   : > { %s399_s16 = sshll.u32 %s633_s12, 2  ;;  %vm180_vm0 = vcmask (%p174_p5), 7168   ;;  %v473_v0 = vmov (%p174_p5), 0.0  }
  0x10   : > { %s173_s19 = scalar_lea.vmem %s624_s0, %s399_s16  ;;  %181 = vst.msk [vmem:[%s626_s2] sm:$0xff] (%p174_p5), %vm180_vm0, %v473_v0  ;;  %182 = vst.msk [vmem:[%s626_s2 + $0x8] sm:$0xff] (%p174_p5), %vm180_vm0, %v473_v0 }
  0x11   : > { %183 = vst.msk [vmem:[%s626_s2 + $0x10] sm:$0xff] (%p174_p5), %vm180_vm0, %v473_v0  ;;  %184 = vst.msk [vmem:[%s626_s2 + $0x18] sm:$0xff] (%p174_p5), %vm180_vm0, %v473_v0 }
  0x12   : > { %185 = vst.msk [vmem:[%s627_s3] sm:$0xff] (%p174_p5), %vm180_vm0, %v473_v0  ;;  %186 = vst.msk [vmem:[%s627_s3 + $0x8] sm:$0xff] (%p174_p5), %vm180_vm0, %v473_v0 }
  0x13   : > { %187 = vst.msk [vmem:[%s627_s3 + $0x10] sm:$0xff] (%p174_p5), %vm180_vm0, %v473_v0  ;;  %188 = vst.msk [vmem:[%s627_s3 + $0x18] sm:$0xff] (%p174_p5), %vm180_vm0, %v473_v0 }
  0x15 PF: > { %v193_v1 = vld [vmem:[%s173_s19] sm:$0xf]  ;;  %vm207_vm1 = vcmask 1043456   ;;  %vm194_vm2 = vcmask 31744   ;;  %v191_v3 = vld [vmem:[%s625_s1 + $0x10] sm:$0xff]  ;;  %v190_v4 = vld [vmem:[%s625_s1 + $0x8] sm:$0xff] }
  0x16   : > { %v189_v2 = vld [vmem:[%s625_s1] sm:$0xff]  ;;  %414 = vmatprep.subr.msk.mxu0 %vm207_vm1, %v193_v1  ;;  %422 = vmatprep.subr.msk.mxu1 %vm207_vm1, %v193_v1  ;;  %v192_v5 = vld [vmem:[%s625_s1 + $0x18] sm:$0xff]  ;;  %vm300_vm3 = vcmask 130048   ;;  %vm317_vm4 = vcmask 7168  }
  0x17   : > { %415 = vmatpush3.msk.msra.mxu0 %vm207_vm1, %v193_v1  ;;  %423 = vmatpush3.msk.msra.mxu1 %vm207_vm1, %v193_v1  ;;  %v297_v23 = vld [vmem:[%s626_s2 + $0x8] sm:$0xff]  ;;  %v296_v29 = vld [vmem:[%s626_s2] sm:$0xff] }
  0x18   : > { %416 = vmatprep.mubr.msk.f32.mxu0 %vm194_vm2, %v189_v2  ;;  %419 = vmatprep.mubr.msk.f32.mxu1 %vm194_vm2, %v191_v3  ;;  %v299_v22 = vld [vmem:[%s626_s2 + $0x18] sm:$0xff]  ;;  %v298_v28 = vld [vmem:[%s626_s2 + $0x10] sm:$0xff] }
  0x19   : > { %417 = vmatmul.mubr.msk.f32.vlgmr.msra.gmra.mrb[0].mxu0 %vm194_vm2, %v190_v4  ;;  %420 = vmatmul.mubr.msk.f32.vlgmr.msra.gmra.mrb[0].mxu1 %vm194_vm2, %v192_v5  ;;  %v323_v34 = vld [vmem:[%s627_s3 + $0x8] sm:$0xff]  ;;  %v322_v35 = vld [vmem:[%s627_s3] sm:$0xff] }
  0x1a   : > { %v325_v40 = vld [vmem:[%s627_s3 + $0x18] sm:$0xff]  ;;  %v324_v41 = vld [vmem:[%s627_s3 + $0x10] sm:$0xff] }
  0xec   : > { %v418_v6 = vpop.f32.mrb[0].mxu0  ;;  %v421_v7 = vpop.f32.mrb[0].mxu1 }
  0xed   : > { %v277_v8 = vpop.f32.mrb[1].mxu0  ;;  %v287_v9 = vpop.f32.mrb[1].mxu1  ;;  %v310_v10 = vsel %vm300_vm3, %v421_v7, 0.0  ;;  %v304_v11 = vsel %vm300_vm3, %v418_v6, 0.0  ;;  %v327_v12 = vmul.f32 %v418_v6, %v418_v6  ;;  %v329_v16 = vmul.f32 %v421_v7, %v421_v7 }
  0xee   : > { %311 = vadd.xlane.f32.xlu1 %v310_v10  ;;  %305 = vadd.xlane.f32.xlu0 %v304_v11  ;;  %v326_v13 = vmul.f32 %v277_v8, %v277_v8  ;;  %v307_v14 = vsel %vm300_vm3, %v287_v9, 0.0  ;;  %v301_v15 = vsel %vm300_vm3, %v277_v8, 0.0  ;;  %v328_v17 = vmul.f32 %v287_v9, %v287_v9 }
  0xef   : > { %v333_v18 = vsel %vm300_vm3, %v327_v12, 0.0  ;;  %v339_v20 = vsel %vm300_vm3, %v329_v16, 0.0 }
  0xf0   : > { %v330_v19 = vsel %vm300_vm3, %v326_v13, 0.0  ;;  %v336_v21 = vsel %vm300_vm3, %v328_v17, 0.0 }
  0xf2   : > { %308 = vadd.xlane.f32.xlu1 %v307_v14  ;;  %302 = vadd.xlane.f32.xlu0 %v301_v15 }
  0xf6   : > { %334 = vadd.xlane.f32.xlu1 %v333_v18  ;;  %331 = vadd.xlane.f32.xlu0 %v330_v19 }
  0xfa   : > { %340 = vadd.xlane.f32.xlu1 %v339_v20  ;;  %337 = vadd.xlane.f32.xlu0 %v336_v21 }
 0x17b   : > { %v312_v24 = vpop.xlane.xlu1 %311  ;;  %v306_v25 = vpop.xlane.xlu0 %305 }
 0x17c   : > { %v316_v26 = vadd.f32 %v312_v24, %v299_v22  ;;  %v314_v27 = vadd.f32 %v306_v25, %v297_v23 }
 0x17e   : > { %321 = vst.msk [vmem:[%s626_s2 + $0x18] sm:$0xff] %vm317_vm4, %v316_v26  ;;  %319 = vst.msk [vmem:[%s626_s2 + $0x8] sm:$0xff] %vm317_vm4, %v314_v27 }
 0x17f   : > { %v309_v30 = vpop.xlane.xlu1 %308  ;;  %v303_v31 = vpop.xlane.xlu0 %302 }
 0x180   : > { %v315_v32 = vadd.f32 %v309_v30, %v298_v28  ;;  %v313_v33 = vadd.f32 %v303_v31, %v296_v29 }
 0x182   : > { %320 = vst.msk [vmem:[%s626_s2 + $0x10] sm:$0xff] %vm317_vm4, %v315_v32  ;;  %318 = vst.msk [vmem:[%s626_s2] sm:$0xff] %vm317_vm4, %v313_v33 }
 0x183   : > { %v335_v36 = vpop.xlane.xlu1 %334  ;;  %v332_v37 = vpop.xlane.xlu0 %331 }
 0x184   : > { %v343_v38 = vadd.f32 %v335_v36, %v323_v34  ;;  %v342_v39 = vadd.f32 %v332_v37, %v322_v35 }
 0x186   : > { %347 = vst.msk [vmem:[%s627_s3 + $0x8] sm:$0xff] %vm317_vm4, %v343_v38  ;;  %346 = vst.msk [vmem:[%s627_s3] sm:$0xff] %vm317_vm4, %v342_v39 }
 0x187   : > { %v341_v42 = vpop.xlane.xlu1 %340  ;;  %v338_v43 = vpop.xlane.xlu0 %337 }
 0x188   : > { %v345_v44 = vadd.f32 %v341_v42, %v325_v40  ;;  %v344_v45 = vadd.f32 %v338_v43, %v324_v41 }
 0x18a   : > { %349 = vst.msk [vmem:[%s627_s3 + $0x18] sm:$0xff] %vm317_vm4, %v345_v44  ;;  %348 = vst.msk [vmem:[%s627_s3 + $0x10] sm:$0xff] %vm317_vm4, %v344_v45 }
 0x18b PF: > { %s14_s14 = sadd.s32 1, %s471_s14   ;;  %s628_s12 = smov %s467_s13 }
 0x18c   : > { %p11_p6 = scmp.ge.s32.totalorder %s14_s14, 4   ;;  %s629_s13 = smov %s631_s15 }
 0x18e   :  { %13 = sbr.rel (!%p11_p6) target bundleno = 2 (0x2), region = 66 }

</bundles_post_ra>
